<compile_context>
chip_gen: v7x
topology: tpu7x:2x2x1
jax: 0.10.0
libtpu: 0.0.40
codegen_flags: <defaults>
</compile_context>

<pallas_src>
import functools

import jax
import jax.numpy as jnp
from jax import lax
from jax.experimental import pallas as pl
from jax.experimental.pallas import tpu as pltpu

LANE = 128
SUBLANE = 8
UNROLL_T_MAX = 32   # full static unroll up to here, fori_loop(unroll=4) beyond


def gru_fc_kernel(xp_ref, whh_ref, bhn_ref, wfc_ref, bfc_ref, out_ref):
    """GRU recurrence + lane-padded final Linear.

    xp_ref  : (3, T, Bp, H) f32  per-gate, per-step input contributions:
                gate 0 (r): x W_ir^T + b_ir + b_hr
                gate 1 (z): x W_iz^T + b_iz + b_hz
                gate 2 (n): x W_in^T + b_in
    whh_ref : (3, H, H) bf16  hidden->hidden weights, transposed per gate
    bhn_ref : (1, H)    f32   b_hn (only hidden bias that can't be folded:
                              it sits inside the r * (...) term)
    wfc_ref : (H, Cp)   bf16  fc weight, transposed, lane-padded to Cp = 128
    bfc_ref : (1, Cp)   f32   fc bias, lane-padded
    out_ref : (Bp, Cp)  f32   lane-padded logits (unmasked vst)
    """
    T = xp_ref.shape[1]

    # Hoist loop-invariant weight loads once (live in vregs across the unroll).
    whh_r = whh_ref[0]
    whh_z = whh_ref[1]
    whh_n = whh_ref[2]
    bhn = bhn_ref[...]

    def step(xp_r, xp_z, xp_n, h):
        hb = h.astype(jnp.bfloat16)          # bf16 MXU operands, f32 accumulate
        hr = jnp.dot(hb, whh_r, preferred_element_type=jnp.float32)
        hz = jnp.dot(hb, whh_z, preferred_element_type=jnp.float32)
        hn = jnp.dot(hb, whh_n, preferred_element_type=jnp.float32) + bhn
        r = jax.nn.sigmoid(xp_r + hr)
        z = jax.nn.sigmoid(xp_z + hz)
        n = jnp.tanh(xp_n + r * hn)
        return (1.0 - z) * n + z * h

    # t = 0: h == 0, so hidden projections reduce to their biases
    # (b_hr / b_hz already folded into xp; only b_hn remains).
    r0 = jax.nn.sigmoid(xp_ref[0, 0])
    z0 = jax.nn.sigmoid(xp_ref[1, 0])
    n0 = jnp.tanh(xp_ref[2, 0] + r0 * bhn)
    h = (1.0 - z0) * n0

    if T <= UNROLL_T_MAX:
        # Fully unrolled, static indices only; LLO overlaps successive steps.
        for t in range(1, T):
            h = step(xp_ref[0, t], xp_ref[1, t], xp_ref[2, t], h)
    else:
        # Bound code size / vreg pressure for long sequences.
        def body(t, h):
            return step(xp_ref[0, t], xp_ref[1, t], xp_ref[2, t], h)
        h = lax.fori_loop(1, T, body, h, unroll=4)

    # Final Linear on the last hidden state; lane-dense (Cp = 128) store.
    out_ref[...] = (
        jnp.dot(h.astype(jnp.bfloat16), wfc_ref[...],
                preferred_element_type=jnp.float32)
        + bfc_ref[...]
    )


def prepare_params(params):
    """One-time, token-independent prep (call once per model, reuse per call)."""
    emb = params["embedding"].astype(jnp.float32)   # (V, E), row 0 zeros
    w_ih = params["w_ih"]                            # (3H, E) gates (r, z, n)
    w_hh = params["w_hh"]                            # (3H, H)
    b_ih = params["b_ih"]                            # (3H,)
    b_hh = params["b_hh"]                            # (3H,)
    w_fc = params["w_fc"]                            # (C, H)
    b_fc = params["b_fc"]                            # (C,)

    H = w_hh.shape[1]
    C = w_fc.shape[0]
    Cp = max(LANE, pl.cdiv(C, LANE) * LANE)
    hi = lax.Precision.HIGHEST

    # Fold input projection + r/z hidden biases into the embedding table:
    #   emb_proj[v] = emb[v] @ W_ih^T + b_ih + [b_hr, b_hz, 0]
    # stored gate-major so the per-call gather lands directly in kernel layout.
    bias_fold = b_ih + jnp.concatenate(
        [b_hh[: 2 * H], jnp.zeros((H,), b_hh.dtype)])
    emb_proj = jnp.dot(emb, w_ih.T, precision=hi) + bias_fold       # (V, 3H)
    emb_proj = emb_proj.reshape(-1, 3, H).transpose(1, 0, 2)        # (3, V, H)

    # Per-gate hidden->hidden weights, transposed for h @ W, bf16 MXU operands.
    whh = jnp.stack([w_hh[:H].T, w_hh[H:2 * H].T, w_hh[2 * H:].T])  # (3, H, H)
    bhn = b_hh[2 * H:].reshape(1, H).astype(jnp.float32)            # (1, H)

    # FC weight/bias, transposed and lane-padded to 128 classes.
    wfc = jnp.zeros((H, Cp), jnp.bfloat16).at[:, :C].set(
        w_fc.T.astype(jnp.bfloat16))
    bfc = jnp.zeros((1, Cp), jnp.float32).at[:, :C].set(b_fc)

    return dict(
        emb_proj=emb_proj.astype(jnp.float32),
        whh=whh.astype(jnp.bfloat16),
        bhn=bhn,
        wfc=wfc,
        bfc=bfc,
    )


def intent_classifier_forward(x_tokens, prep, num_classes):
    """x_tokens: (B, T) int32 token ids. Returns logits (B, num_classes)."""
    B, T = x_tokens.shape
    H = prep["bhn"].shape[1]
    Cp = prep["wfc"].shape[1]

    # Pad batch to a sublane multiple (8) with padding token 0; padded rows are
    # computed and discarded (matches unmasked-pad semantics of the reference).
    Bp = pl.cdiv(B, SUBLANE) * SUBLANE
    tok = x_tokens if Bp == B else jnp.pad(x_tokens, ((0, Bp - B), (0, 0)))

    # Per-token gather of the precomputed, gate-major projected embeddings:
    # (3, V, H) taken with (T, Bp) token ids -> (3, T, Bp, H), no transpose.
    # TODO(synk): the embedding gather stays in JAX glue; an in-kernel gather
    # would need scalar-prefetch + manual DMA and is not worth it at this size.
    xp = jnp.take(prep["emb_proj"], tok.T, axis=1)                  # (3,T,Bp,H)

    flops = T * (3 * 2 * Bp * H * H + 12 * Bp * H) + 2 * Bp * H * Cp
    transcendentals = T * 3 * Bp * H
    bytes_accessed = (4 * xp.size + 2 * prep["whh"].size + 4 * prep["bhn"].size
                      + 2 * prep["wfc"].size + 4 * prep["bfc"].size
                      + 4 * Bp * Cp)

    vmem = pl.BlockSpec(memory_space=pltpu.MemorySpace.VMEM)
    out_padded = pl.pallas_call(
        gru_fc_kernel,
        out_shape=jax.ShapeDtypeStruct((Bp, Cp), jnp.float32),
        in_specs=[vmem] * 5,
        out_specs=vmem,
        cost_estimate=pl.CostEstimate(
            flops=flops,
            transcendentals=transcendentals,
            bytes_accessed=bytes_accessed),
    )(xp, prep["whh"], prep["bhn"], prep["wfc"], prep["bfc"])

    return out_padded[:B, :num_classes]


def reference_forward(x_tokens, params):
    """Pure-JAX reference with PyTorch nn.GRU / nn.Linear semantics."""
    hi = lax.Precision.HIGHEST
    emb = params["embedding"]
    w_ih, w_hh = params["w_ih"], params["w_hh"]
    b_ih, b_hh = params["b_ih"], params["b_hh"]
    H = w_hh.shape[1]
    x = jnp.take(emb, x_tokens, axis=0)            # (B, T, E)
    B, T, _ = x.shape
    h = jnp.zeros((B, H), jnp.float32)
    for t in range(T):
        gi = jnp.dot(x[:, t, :], w_ih.T, precision=hi) + b_ih
        gh = jnp.dot(h, w_hh.T, precision=hi) + b_hh
        r = jax.nn.sigmoid(gi[:, :H] + gh[:, :H])
        z = jax.nn.sigmoid(gi[:, H:2 * H] + gh[:, H:2 * H])
        n = jnp.tanh(gi[:, 2 * H:] + r * gh[:, 2 * H:])
        h = (1.0 - z) * n + z * h
    return jnp.dot(h, params["w_fc"].T, precision=hi) + params["b_fc"]


def init_params(key, vocab_size, embed_dim, hidden_dim, num_classes):
    """Deterministic synthetic init, PyTorch parameter layout."""
    ks = jax.random.split(key, 7)
    k = 1.0 / jnp.sqrt(hidden_dim)

    emb = jax.random.normal(ks[0], (vocab_size, embed_dim), jnp.float32)
    emb = emb.at[0].set(0.0)                                   # padding_idx=0

    w_ih = jax.random.uniform(ks[1], (3 * hidden_dim, embed_dim),
                              jnp.float32, -k, k)
    w_hh = jax.random.uniform(ks[2], (3 * hidden_dim, hidden_dim),
                              jnp.float32, -k, k)
    b_ih = jax.random.uniform(ks[3], (3 * hidden_dim,), jnp.float32, -k, k)
    b_hh = jax.random.uniform(ks[4], (3 * hidden_dim,), jnp.float32, -k, k)
    w_fc = jax.random.uniform(ks[5], (num_classes, hidden_dim),
                              jnp.float32, -k, k)
    b_fc = jax.random.uniform(ks[6], (num_classes,), jnp.float32, -k, k)

    return dict(embedding=emb, w_ih=w_ih, w_hh=w_hh, b_ih=b_ih, b_hh=b_hh,
                w_fc=w_fc, b_fc=b_fc)


if __name__ == "__main__":
    VOCAB, EMBED, HIDDEN, NUM_CLASSES = 50, 32, 32, 8
    B, T = 2, 8

    key = jax.random.PRNGKey(0)
    k_params, k_tokens = jax.random.split(key)

    params = init_params(k_params, VOCAB, EMBED, HIDDEN, NUM_CLASSES)
    x_tokens = jax.random.randint(k_tokens, (B, T), 0, VOCAB, dtype=jnp.int32)

    # One-time, token-independent prep (hoisted out of the per-call path).
    prep = jax.tree_util.tree_map(jax.device_put, prepare_params(params))

    fwd = jax.jit(intent_classifier_forward, static_argnums=(2,))
    logits = fwd(x_tokens, prep, NUM_CLASSES)
    jax.block_until_ready(logits)

    assert logits.shape == (B, NUM_CLASSES)
    assert logits.dtype == jnp.float32

    ref = reference_forward(x_tokens, params)
    max_err = jnp.max(jnp.abs(logits - ref))
    assert jnp.allclose(logits, ref, atol=1e-2, rtol=1e-2), (
        f"max abs diff vs reference: {max_err}")

    print("KERNEL_OK")
</pallas_src>

<mosaic_0001>
module attributes {stable_mosaic.version = 11 : i64} {
  func.func @gru_fc_kernel(%arg0: memref<3x8x8x32xf32, #tpu.memory_space<vmem>>, %arg1: memref<3x32x32xbf16, #tpu.memory_space<vmem>>, %arg2: memref<1x32xf32, #tpu.memory_space<vmem>>, %arg3: memref<32x128xbf16, #tpu.memory_space<vmem>>, %arg4: memref<1x128xf32, #tpu.memory_space<vmem>>, %arg5: memref<8x128xf32, #tpu.memory_space<vmem>>) attributes {dimension_semantics = [], scalar_prefetch = 0 : i64, scratch_operands = 0 : i64, tpu.core_type = #tpu.core_type<tc>} {
    %c0 = arith.constant 0 : index
    %c0_0 = arith.constant 0 : index
    %c0_1 = arith.constant 0 : index
    %0 = vector.load %arg1[%c0, %c0_0, %c0_1] : memref<3x32x32xbf16, #tpu.memory_space<vmem>>, vector<1x32x32xbf16>
    %1 = vector.shape_cast %0 : vector<1x32x32xbf16> to vector<32x32xbf16>
    %c1 = arith.constant 1 : index
    %c0_2 = arith.constant 0 : index
    %c0_3 = arith.constant 0 : index
    %2 = vector.load %arg1[%c1, %c0_2, %c0_3] : memref<3x32x32xbf16, #tpu.memory_space<vmem>>, vector<1x32x32xbf16>
    %3 = vector.shape_cast %2 : vector<1x32x32xbf16> to vector<32x32xbf16>
    %c2 = arith.constant 2 : index
    %c0_4 = arith.constant 0 : index
    %c0_5 = arith.constant 0 : index
    %4 = vector.load %arg1[%c2, %c0_4, %c0_5] : memref<3x32x32xbf16, #tpu.memory_space<vmem>>, vector<1x32x32xbf16>
    %5 = vector.shape_cast %4 : vector<1x32x32xbf16> to vector<32x32xbf16>
    %c0_6 = arith.constant 0 : index
    %c0_7 = arith.constant 0 : index
    %6 = vector.load %arg2[%c0_6, %c0_7] : memref<1x32xf32, #tpu.memory_space<vmem>>, vector<1x32xf32>
    %c0_8 = arith.constant 0 : index
    %c0_9 = arith.constant 0 : index
    %c0_10 = arith.constant 0 : index
    %c0_11 = arith.constant 0 : index
    %7 = vector.load %arg0[%c0_8, %c0_9, %c0_10, %c0_11] : memref<3x8x8x32xf32, #tpu.memory_space<vmem>>, vector<1x1x8x32xf32>
    %8 = vector.shape_cast %7 : vector<1x1x8x32xf32> to vector<8x32xf32>
    %9 = arith.negf %8 : vector<8x32xf32>
    %10 = math.exp %9 : vector<8x32xf32>
    %cst = arith.constant 1.000000e+00 : f32
    %11 = vector.broadcast %cst : f32 to vector<8x32xf32>
    %12 = arith.addf %11, %10 : vector<8x32xf32>
    %13 = arith.divf %11, %12 : vector<8x32xf32>
    %c1_12 = arith.constant 1 : index
    %c0_13 = arith.constant 0 : index
    %c0_14 = arith.constant 0 : index
    %c0_15 = arith.constant 0 : index
    %14 = vector.load %arg0[%c1_12, %c0_13, %c0_14, %c0_15] : memref<3x8x8x32xf32, #tpu.memory_space<vmem>>, vector<1x1x8x32xf32>
    %15 = vector.shape_cast %14 : vector<1x1x8x32xf32> to vector<8x32xf32>
    %16 = arith.negf %15 : vector<8x32xf32>
    %17 = math.exp %16 : vector<8x32xf32>
    %cst_16 = arith.constant 1.000000e+00 : f32
    %18 = vector.broadcast %cst_16 : f32 to vector<8x32xf32>
    %19 = arith.addf %18, %17 : vector<8x32xf32>
    %20 = arith.divf %18, %19 : vector<8x32xf32>
    %c2_17 = arith.constant 2 : index
    %c0_18 = arith.constant 0 : index
    %c0_19 = arith.constant 0 : index
    %c0_20 = arith.constant 0 : index
    %21 = vector.load %arg0[%c2_17, %c0_18, %c0_19, %c0_20] : memref<3x8x8x32xf32, #tpu.memory_space<vmem>>, vector<1x1x8x32xf32>
    %22 = vector.shape_cast %21 : vector<1x1x8x32xf32> to vector<8x32xf32>
    %23 = vector.broadcast %6 : vector<1x32xf32> to vector<8x32xf32>
    %24 = arith.mulf %13, %23 : vector<8x32xf32>
    %25 = arith.addf %22, %24 : vector<8x32xf32>
    %26 = math.tanh %25 : vector<8x32xf32>
    %cst_21 = arith.constant 1.000000e+00 : f32
    %27 = vector.broadcast %cst_21 : f32 to vector<8x32xf32>
    %28 = arith.subf %27, %20 : vector<8x32xf32>
    %29 = arith.mulf %28, %26 : vector<8x32xf32>
    %c0_22 = arith.constant 0 : index
    %c1_23 = arith.constant 1 : index
    %c0_24 = arith.constant 0 : index
    %c0_25 = arith.constant 0 : index
    %30 = vector.load %arg0[%c0_22, %c1_23, %c0_24, %c0_25] : memref<3x8x8x32xf32, #tpu.memory_space<vmem>>, vector<1x1x8x32xf32>
    %31 = vector.shape_cast %30 : vector<1x1x8x32xf32> to vector<8x32xf32>
    %c1_26 = arith.constant 1 : index
    %c1_27 = arith.constant 1 : index
    %c0_28 = arith.constant 0 : index
    %c0_29 = arith.constant 0 : index
    %32 = vector.load %arg0[%c1_26, %c1_27, %c0_28, %c0_29] : memref<3x8x8x32xf32, #tpu.memory_space<vmem>>, vector<1x1x8x32xf32>
    %33 = vector.shape_cast %32 : vector<1x1x8x32xf32> to vector<8x32xf32>
    %c2_30 = arith.constant 2 : index
    %c1_31 = arith.constant 1 : index
    %c0_32 = arith.constant 0 : index
    %c0_33 = arith.constant 0 : index
    %34 = vector.load %arg0[%c2_30, %c1_31, %c0_32, %c0_33] : memref<3x8x8x32xf32, #tpu.memory_space<vmem>>, vector<1x1x8x32xf32>
    %35 = vector.shape_cast %34 : vector<1x1x8x32xf32> to vector<8x32xf32>
    %36 = arith.truncf %29 : vector<8x32xf32> to vector<8x32xbf16>
    %cst_34 = arith.constant dense<0.000000e+00> : vector<8x32xf32>
    %37 = tpu.matmul %36, %1, %cst_34 {dimension_numbers = #tpu.dot_dimension_numbers<[1], [0], [0], [1], [0, 0, 1, 1], [], []>} : vector<8x32xbf16>, vector<32x32xbf16>, vector<8x32xf32> -> vector<8x32xf32>
    %cst_35 = arith.constant dense<0.000000e+00> : vector<8x32xf32>
    %38 = tpu.matmul %36, %3, %cst_35 {dimension_numbers = #tpu.dot_dimension_numbers<[1], [0], [0], [1], [0, 0, 1, 1], [], []>} : vector<8x32xbf16>, vector<32x32xbf16>, vector<8x32xf32> -> vector<8x32xf32>
    %cst_36 = arith.constant dense<0.000000e+00> : vector<8x32xf32>
    %39 = tpu.matmul %36, %5, %cst_36 {dimension_numbers = #tpu.dot_dimension_numbers<[1], [0], [0], [1], [0, 0, 1, 1], [], []>} : vector<8x32xbf16>, vector<32x32xbf16>, vector<8x32xf32> -> vector<8x32xf32>
    %40 = vector.broadcast %6 : vector<1x32xf32> to vector<8x32xf32>
    %41 = arith.addf %39, %40 : vector<8x32xf32>
    %42 = arith.addf %31, %37 : vector<8x32xf32>
    %43 = arith.negf %42 : vector<8x32xf32>
    %44 = math.exp %43 : vector<8x32xf32>
    %cst_37 = arith.constant 1.000000e+00 : f32
    %45 = vector.broadcast %cst_37 : f32 to vector<8x32xf32>
    %46 = arith.addf %45, %44 : vector<8x32xf32>
    %47 = arith.divf %45, %46 : vector<8x32xf32>
    %48 = arith.addf %33, %38 : vector<8x32xf32>
    %49 = arith.negf %48 : vector<8x32xf32>
    %50 = math.exp %49 : vector<8x32xf32>
    %cst_38 = arith.constant 1.000000e+00 : f32
    %51 = vector.broadcast %cst_38 : f32 to vector<8x32xf32>
    %52 = arith.addf %51, %50 : vector<8x32xf32>
    %53 = arith.divf %51, %52 : vector<8x32xf32>
    %54 = arith.mulf %47, %41 : vector<8x32xf32>
    %55 = arith.addf %35, %54 : vector<8x32xf32>
    %56 = math.tanh %55 : vector<8x32xf32>
    %cst_39 = arith.constant 1.000000e+00 : f32
    %57 = vector.broadcast %cst_39 : f32 to vector<8x32xf32>
    %58 = arith.subf %57, %53 : vector<8x32xf32>
    %59 = arith.mulf %58, %56 : vector<8x32xf32>
    %60 = arith.mulf %53, %29 : vector<8x32xf32>
    %61 = arith.addf %59, %60 : vector<8x32xf32>
    %c0_40 = arith.constant 0 : index
    %c2_41 = arith.constant 2 : index
    %c0_42 = arith.constant 0 : index
    %c0_43 = arith.constant 0 : index
    %62 = vector.load %arg0[%c0_40, %c2_41, %c0_42, %c0_43] : memref<3x8x8x32xf32, #tpu.memory_space<vmem>>, vector<1x1x8x32xf32>
    %63 = vector.shape_cast %62 : vector<1x1x8x32xf32> to vector<8x32xf32>
    %c1_44 = arith.constant 1 : index
    %c2_45 = arith.constant 2 : index
    %c0_46 = arith.constant 0 : index
    %c0_47 = arith.constant 0 : index
    %64 = vector.load %arg0[%c1_44, %c2_45, %c0_46, %c0_47] : memref<3x8x8x32xf32, #tpu.memory_space<vmem>>, vector<1x1x8x32xf32>
    %65 = vector.shape_cast %64 : vector<1x1x8x32xf32> to vector<8x32xf32>
    %c2_48 = arith.constant 2 : index
    %c2_49 = arith.constant 2 : index
    %c0_50 = arith.constant 0 : index
    %c0_51 = arith.constant 0 : index
    %66 = vector.load %arg0[%c2_48, %c2_49, %c0_50, %c0_51] : memref<3x8x8x32xf32, #tpu.memory_space<vmem>>, vector<1x1x8x32xf32>
    %67 = vector.shape_cast %66 : vector<1x1x8x32xf32> to vector<8x32xf32>
    %68 = arith.truncf %61 : vector<8x32xf32> to vector<8x32xbf16>
    %cst_52 = arith.constant dense<0.000000e+00> : vector<8x32xf32>
    %69 = tpu.matmul %68, %1, %cst_52 {dimension_numbers = #tpu.dot_dimension_numbers<[1], [0], [0], [1], [0, 0, 1, 1], [], []>} : vector<8x32xbf16>, vector<32x32xbf16>, vector<8x32xf32> -> vector<8x32xf32>
    %cst_53 = arith.constant dense<0.000000e+00> : vector<8x32xf32>
    %70 = tpu.matmul %68, %3, %cst_53 {dimension_numbers = #tpu.dot_dimension_numbers<[1], [0], [0], [1], [0, 0, 1, 1], [], []>} : vector<8x32xbf16>, vector<32x32xbf16>, vector<8x32xf32> -> vector<8x32xf32>
    %cst_54 = arith.constant dense<0.000000e+00> : vector<8x32xf32>
    %71 = tpu.matmul %68, %5, %cst_54 {dimension_numbers = #tpu.dot_dimension_numbers<[1], [0], [0], [1], [0, 0, 1, 1], [], []>} : vector<8x32xbf16>, vector<32x32xbf16>, vector<8x32xf32> -> vector<8x32xf32>
    %72 = vector.broadcast %6 : vector<1x32xf32> to vector<8x32xf32>
    %73 = arith.addf %71, %72 : vector<8x32xf32>
    %74 = arith.addf %63, %69 : vector<8x32xf32>
    %75 = arith.negf %74 : vector<8x32xf32>
    %76 = math.exp %75 : vector<8x32xf32>
    %cst_55 = arith.constant 1.000000e+00 : f32
    %77 = vector.broadcast %cst_55 : f32 to vector<8x32xf32>
    %78 = arith.addf %77, %76 : vector<8x32xf32>
    %79 = arith.divf %77, %78 : vector<8x32xf32>
    %80 = arith.addf %65, %70 : vector<8x32xf32>
    %81 = arith.negf %80 : vector<8x32xf32>
    %82 = math.exp %81 : vector<8x32xf32>
    %cst_56 = arith.constant 1.000000e+00 : f32
    %83 = vector.broadcast %cst_56 : f32 to vector<8x32xf32>
    %84 = arith.addf %83, %82 : vector<8x32xf32>
    %85 = arith.divf %83, %84 : vector<8x32xf32>
    %86 = arith.mulf %79, %73 : vector<8x32xf32>
    %87 = arith.addf %67, %86 : vector<8x32xf32>
    %88 = math.tanh %87 : vector<8x32xf32>
    %cst_57 = arith.constant 1.000000e+00 : f32
    %89 = vector.broadcast %cst_57 : f32 to vector<8x32xf32>
    %90 = arith.subf %89, %85 : vector<8x32xf32>
    %91 = arith.mulf %90, %88 : vector<8x32xf32>
    %92 = arith.mulf %85, %61 : vector<8x32xf32>
    %93 = arith.addf %91, %92 : vector<8x32xf32>
    %c0_58 = arith.constant 0 : index
    %c3 = arith.constant 3 : index
    %c0_59 = arith.constant 0 : index
    %c0_60 = arith.constant 0 : index
    %94 = vector.load %arg0[%c0_58, %c3, %c0_59, %c0_60] : memref<3x8x8x32xf32, #tpu.memory_space<vmem>>, vector<1x1x8x32xf32>
    %95 = vector.shape_cast %94 : vector<1x1x8x32xf32> to vector<8x32xf32>
    %c1_61 = arith.constant 1 : index
    %c3_62 = arith.constant 3 : index
    %c0_63 = arith.constant 0 : index
    %c0_64 = arith.constant 0 : index
    %96 = vector.load %arg0[%c1_61, %c3_62, %c0_63, %c0_64] : memref<3x8x8x32xf32, #tpu.memory_space<vmem>>, vector<1x1x8x32xf32>
    %97 = vector.shape_cast %96 : vector<1x1x8x32xf32> to vector<8x32xf32>
    %c2_65 = arith.constant 2 : index
    %c3_66 = arith.constant 3 : index
    %c0_67 = arith.constant 0 : index
    %c0_68 = arith.constant 0 : index
    %98 = vector.load %arg0[%c2_65, %c3_66, %c0_67, %c0_68] : memref<3x8x8x32xf32, #tpu.memory_space<vmem>>, vector<1x1x8x32xf32>
    %99 = vector.shape_cast %98 : vector<1x1x8x32xf32> to vector<8x32xf32>
    %100 = arith.truncf %93 : vector<8x32xf32> to vector<8x32xbf16>
    %cst_69 = arith.constant dense<0.000000e+00> : vector<8x32xf32>
    %101 = tpu.matmul %100, %1, %cst_69 {dimension_numbers = #tpu.dot_dimension_numbers<[1], [0], [0], [1], [0, 0, 1, 1], [], []>} : vector<8x32xbf16>, vector<32x32xbf16>, vector<8x32xf32> -> vector<8x32xf32>
    %cst_70 = arith.constant dense<0.000000e+00> : vector<8x32xf32>
    %102 = tpu.matmul %100, %3, %cst_70 {dimension_numbers = #tpu.dot_dimension_numbers<[1], [0], [0], [1], [0, 0, 1, 1], [], []>} : vector<8x32xbf16>, vector<32x32xbf16>, vector<8x32xf32> -> vector<8x32xf32>
    %cst_71 = arith.constant dense<0.000000e+00> : vector<8x32xf32>
    %103 = tpu.matmul %100, %5, %cst_71 {dimension_numbers = #tpu.dot_dimension_numbers<[1], [0], [0], [1], [0, 0, 1, 1], [], []>} : vector<8x32xbf16>, vector<32x32xbf16>, vector<8x32xf32> -> vector<8x32xf32>
    %104 = vector.broadcast %6 : vector<1x32xf32> to vector<8x32xf32>
    %105 = arith.addf %103, %104 : vector<8x32xf32>
    %106 = arith.addf %95, %101 : vector<8x32xf32>
    %107 = arith.negf %106 : vector<8x32xf32>
    %108 = math.exp %107 : vector<8x32xf32>
    %cst_72 = arith.constant 1.000000e+00 : f32
    %109 = vector.broadcast %cst_72 : f32 to vector<8x32xf32>
    %110 = arith.addf %109, %108 : vector<8x32xf32>
    %111 = arith.divf %109, %110 : vector<8x32xf32>
    %112 = arith.addf %97, %102 : vector<8x32xf32>
    %113 = arith.negf %112 : vector<8x32xf32>
    %114 = math.exp %113 : vector<8x32xf32>
    %cst_73 = arith.constant 1.000000e+00 : f32
    %115 = vector.broadcast %cst_73 : f32 to vector<8x32xf32>
    %116 = arith.addf %115, %114 : vector<8x32xf32>
    %117 = arith.divf %115, %116 : vector<8x32xf32>
    %118 = arith.mulf %111, %105 : vector<8x32xf32>
    %119 = arith.addf %99, %118 : vector<8x32xf32>
    %120 = math.tanh %119 : vector<8x32xf32>
    %cst_74 = arith.constant 1.000000e+00 : f32
    %121 = vector.broadcast %cst_74 : f32 to vector<8x32xf32>
    %122 = arith.subf %121, %117 : vector<8x32xf32>
    %123 = arith.mulf %122, %120 : vector<8x32xf32>
    %124 = arith.mulf %117, %93 : vector<8x32xf32>
    %125 = arith.addf %123, %124 : vector<8x32xf32>
    %c0_75 = arith.constant 0 : index
    %c4 = arith.constant 4 : index
    %c0_76 = arith.constant 0 : index
    %c0_77 = arith.constant 0 : index
    %126 = vector.load %arg0[%c0_75, %c4, %c0_76, %c0_77] : memref<3x8x8x32xf32, #tpu.memory_space<vmem>>, vector<1x1x8x32xf32>
    %127 = vector.shape_cast %126 : vector<1x1x8x32xf32> to vector<8x32xf32>
    %c1_78 = arith.constant 1 : index
    %c4_79 = arith.constant 4 : index
    %c0_80 = arith.constant 0 : index
    %c0_81 = arith.constant 0 : index
    %128 = vector.load %arg0[%c1_78, %c4_79, %c0_80, %c0_81] : memref<3x8x8x32xf32, #tpu.memory_space<vmem>>, vector<1x1x8x32xf32>
    %129 = vector.shape_cast %128 : vector<1x1x8x32xf32> to vector<8x32xf32>
    %c2_82 = arith.constant 2 : index
    %c4_83 = arith.constant 4 : index
    %c0_84 = arith.constant 0 : index
    %c0_85 = arith.constant 0 : index
    %130 = vector.load %arg0[%c2_82, %c4_83, %c0_84, %c0_85] : memref<3x8x8x32xf32, #tpu.memory_space<vmem>>, vector<1x1x8x32xf32>
    %131 = vector.shape_cast %130 : vector<1x1x8x32xf32> to vector<8x32xf32>
    %132 = arith.truncf %125 : vector<8x32xf32> to vector<8x32xbf16>
    %cst_86 = arith.constant dense<0.000000e+00> : vector<8x32xf32>
    %133 = tpu.matmul %132, %1, %cst_86 {dimension_numbers = #tpu.dot_dimension_numbers<[1], [0], [0], [1], [0, 0, 1, 1], [], []>} : vector<8x32xbf16>, vector<32x32xbf16>, vector<8x32xf32> -> vector<8x32xf32>
    %cst_87 = arith.constant dense<0.000000e+00> : vector<8x32xf32>
    %134 = tpu.matmul %132, %3, %cst_87 {dimension_numbers = #tpu.dot_dimension_numbers<[1], [0], [0], [1], [0, 0, 1, 1], [], []>} : vector<8x32xbf16>, vector<32x32xbf16>, vector<8x32xf32> -> vector<8x32xf32>
    %cst_88 = arith.constant dense<0.000000e+00> : vector<8x32xf32>
    %135 = tpu.matmul %132, %5, %cst_88 {dimension_numbers = #tpu.dot_dimension_numbers<[1], [0], [0], [1], [0, 0, 1, 1], [], []>} : vector<8x32xbf16>, vector<32x32xbf16>, vector<8x32xf32> -> vector<8x32xf32>
    %136 = vector.broadcast %6 : vector<1x32xf32> to vector<8x32xf32>
    %137 = arith.addf %135, %136 : vector<8x32xf32>
    %138 = arith.addf %127, %133 : vector<8x32xf32>
    %139 = arith.negf %138 : vector<8x32xf32>
    %140 = math.exp %139 : vector<8x32xf32>
    %cst_89 = arith.constant 1.000000e+00 : f32
    %141 = vector.broadcast %cst_89 : f32 to vector<8x32xf32>
    %142 = arith.addf %141, %140 : vector<8x32xf32>
    %143 = arith.divf %141, %142 : vector<8x32xf32>
    %144 = arith.addf %129, %134 : vector<8x32xf32>
    %145 = arith.negf %144 : vector<8x32xf32>
    %146 = math.exp %145 : vector<8x32xf32>
    %cst_90 = arith.constant 1.000000e+00 : f32
    %147 = vector.broadcast %cst_90 : f32 to vector<8x32xf32>
    %148 = arith.addf %147, %146 : vector<8x32xf32>
    %149 = arith.divf %147, %148 : vector<8x32xf32>
    %150 = arith.mulf %143, %137 : vector<8x32xf32>
    %151 = arith.addf %131, %150 : vector<8x32xf32>
    %152 = math.tanh %151 : vector<8x32xf32>
    %cst_91 = arith.constant 1.000000e+00 : f32
    %153 = vector.broadcast %cst_91 : f32 to vector<8x32xf32>
    %154 = arith.subf %153, %149 : vector<8x32xf32>
    %155 = arith.mulf %154, %152 : vector<8x32xf32>
    %156 = arith.mulf %149, %125 : vector<8x32xf32>
    %157 = arith.addf %155, %156 : vector<8x32xf32>
    %c0_92 = arith.constant 0 : index
    %c5 = arith.constant 5 : index
    %c0_93 = arith.constant 0 : index
    %c0_94 = arith.constant 0 : index
    %158 = vector.load %arg0[%c0_92, %c5, %c0_93, %c0_94] : memref<3x8x8x32xf32, #tpu.memory_space<vmem>>, vector<1x1x8x32xf32>
    %159 = vector.shape_cast %158 : vector<1x1x8x32xf32> to vector<8x32xf32>
    %c1_95 = arith.constant 1 : index
    %c5_96 = arith.constant 5 : index
    %c0_97 = arith.constant 0 : index
    %c0_98 = arith.constant 0 : index
    %160 = vector.load %arg0[%c1_95, %c5_96, %c0_97, %c0_98] : memref<3x8x8x32xf32, #tpu.memory_space<vmem>>, vector<1x1x8x32xf32>
    %161 = vector.shape_cast %160 : vector<1x1x8x32xf32> to vector<8x32xf32>
    %c2_99 = arith.constant 2 : index
    %c5_100 = arith.constant 5 : index
    %c0_101 = arith.constant 0 : index
    %c0_102 = arith.constant 0 : index
    %162 = vector.load %arg0[%c2_99, %c5_100, %c0_101, %c0_102] : memref<3x8x8x32xf32, #tpu.memory_space<vmem>>, vector<1x1x8x32xf32>
    %163 = vector.shape_cast %162 : vector<1x1x8x32xf32> to vector<8x32xf32>
    %164 = arith.truncf %157 : vector<8x32xf32> to vector<8x32xbf16>
    %cst_103 = arith.constant dense<0.000000e+00> : vector<8x32xf32>
    %165 = tpu.matmul %164, %1, %cst_103 {dimension_numbers = #tpu.dot_dimension_numbers<[1], [0], [0], [1], [0, 0, 1, 1], [], []>} : vector<8x32xbf16>, vector<32x32xbf16>, vector<8x32xf32> -> vector<8x32xf32>
    %cst_104 = arith.constant dense<0.000000e+00> : vector<8x32xf32>
    %166 = tpu.matmul %164, %3, %cst_104 {dimension_numbers = #tpu.dot_dimension_numbers<[1], [0], [0], [1], [0, 0, 1, 1], [], []>} : vector<8x32xbf16>, vector<32x32xbf16>, vector<8x32xf32> -> vector<8x32xf32>
    %cst_105 = arith.constant dense<0.000000e+00> : vector<8x32xf32>
    %167 = tpu.matmul %164, %5, %cst_105 {dimension_numbers = #tpu.dot_dimension_numbers<[1], [0], [0], [1], [0, 0, 1, 1], [], []>} : vector<8x32xbf16>, vector<32x32xbf16>, vector<8x32xf32> -> vector<8x32xf32>
    %168 = vector.broadcast %6 : vector<1x32xf32> to vector<8x32xf32>
    %169 = arith.addf %167, %168 : vector<8x32xf32>
    %170 = arith.addf %159, %165 : vector<8x32xf32>
    %171 = arith.negf %170 : vector<8x32xf32>
    %172 = math.exp %171 : vector<8x32xf32>
    %cst_106 = arith.constant 1.000000e+00 : f32
    %173 = vector.broadcast %cst_106 : f32 to vector<8x32xf32>
    %174 = arith.addf %173, %172 : vector<8x32xf32>
    %175 = arith.divf %173, %174 : vector<8x32xf32>
    %176 = arith.addf %161, %166 : vector<8x32xf32>
    %177 = arith.negf %176 : vector<8x32xf32>
    %178 = math.exp %177 : vector<8x32xf32>
    %cst_107 = arith.constant 1.000000e+00 : f32
    %179 = vector.broadcast %cst_107 : f32 to vector<8x32xf32>
    %180 = arith.addf %179, %178 : vector<8x32xf32>
    %181 = arith.divf %179, %180 : vector<8x32xf32>
    %182 = arith.mulf %175, %169 : vector<8x32xf32>
    %183 = arith.addf %163, %182 : vector<8x32xf32>
    %184 = math.tanh %183 : vector<8x32xf32>
    %cst_108 = arith.constant 1.000000e+00 : f32
    %185 = vector.broadcast %cst_108 : f32 to vector<8x32xf32>
    %186 = arith.subf %185, %181 : vector<8x32xf32>
    %187 = arith.mulf %186, %184 : vector<8x32xf32>
    %188 = arith.mulf %181, %157 : vector<8x32xf32>
    %189 = arith.addf %187, %188 : vector<8x32xf32>
    %c0_109 = arith.constant 0 : index
    %c6 = arith.constant 6 : index
    %c0_110 = arith.constant 0 : index
    %c0_111 = arith.constant 0 : index
    %190 = vector.load %arg0[%c0_109, %c6, %c0_110, %c0_111] : memref<3x8x8x32xf32, #tpu.memory_space<vmem>>, vector<1x1x8x32xf32>
    %191 = vector.shape_cast %190 : vector<1x1x8x32xf32> to vector<8x32xf32>
    %c1_112 = arith.constant 1 : index
    %c6_113 = arith.constant 6 : index
    %c0_114 = arith.constant 0 : index
    %c0_115 = arith.constant 0 : index
    %192 = vector.load %arg0[%c1_112, %c6_113, %c0_114, %c0_115] : memref<3x8x8x32xf32, #tpu.memory_space<vmem>>, vector<1x1x8x32xf32>
    %193 = vector.shape_cast %192 : vector<1x1x8x32xf32> to vector<8x32xf32>
    %c2_116 = arith.constant 2 : index
    %c6_117 = arith.constant 6 : index
    %c0_118 = arith.constant 0 : index
    %c0_119 = arith.constant 0 : index
    %194 = vector.load %arg0[%c2_116, %c6_117, %c0_118, %c0_119] : memref<3x8x8x32xf32, #tpu.memory_space<vmem>>, vector<1x1x8x32xf32>
    %195 = vector.shape_cast %194 : vector<1x1x8x32xf32> to vector<8x32xf32>
    %196 = arith.truncf %189 : vector<8x32xf32> to vector<8x32xbf16>
    %cst_120 = arith.constant dense<0.000000e+00> : vector<8x32xf32>
    %197 = tpu.matmul %196, %1, %cst_120 {dimension_numbers = #tpu.dot_dimension_numbers<[1], [0], [0], [1], [0, 0, 1, 1], [], []>} : vector<8x32xbf16>, vector<32x32xbf16>, vector<8x32xf32> -> vector<8x32xf32>
    %cst_121 = arith.constant dense<0.000000e+00> : vector<8x32xf32>
    %198 = tpu.matmul %196, %3, %cst_121 {dimension_numbers = #tpu.dot_dimension_numbers<[1], [0], [0], [1], [0, 0, 1, 1], [], []>} : vector<8x32xbf16>, vector<32x32xbf16>, vector<8x32xf32> -> vector<8x32xf32>
    %cst_122 = arith.constant dense<0.000000e+00> : vector<8x32xf32>
    %199 = tpu.matmul %196, %5, %cst_122 {dimension_numbers = #tpu.dot_dimension_numbers<[1], [0], [0], [1], [0, 0, 1, 1], [], []>} : vector<8x32xbf16>, vector<32x32xbf16>, vector<8x32xf32> -> vector<8x32xf32>
    %200 = vector.broadcast %6 : vector<1x32xf32> to vector<8x32xf32>
    %201 = arith.addf %199, %200 : vector<8x32xf32>
    %202 = arith.addf %191, %197 : vector<8x32xf32>
    %203 = arith.negf %202 : vector<8x32xf32>
    %204 = math.exp %203 : vector<8x32xf32>
    %cst_123 = arith.constant 1.000000e+00 : f32
    %205 = vector.broadcast %cst_123 : f32 to vector<8x32xf32>
    %206 = arith.addf %205, %204 : vector<8x32xf32>
    %207 = arith.divf %205, %206 : vector<8x32xf32>
    %208 = arith.addf %193, %198 : vector<8x32xf32>
    %209 = arith.negf %208 : vector<8x32xf32>
    %210 = math.exp %209 : vector<8x32xf32>
    %cst_124 = arith.constant 1.000000e+00 : f32
    %211 = vector.broadcast %cst_124 : f32 to vector<8x32xf32>
    %212 = arith.addf %211, %210 : vector<8x32xf32>
    %213 = arith.divf %211, %212 : vector<8x32xf32>
    %214 = arith.mulf %207, %201 : vector<8x32xf32>
    %215 = arith.addf %195, %214 : vector<8x32xf32>
    %216 = math.tanh %215 : vector<8x32xf32>
    %cst_125 = arith.constant 1.000000e+00 : f32
    %217 = vector.broadcast %cst_125 : f32 to vector<8x32xf32>
    %218 = arith.subf %217, %213 : vector<8x32xf32>
    %219 = arith.mulf %218, %216 : vector<8x32xf32>
    %220 = arith.mulf %213, %189 : vector<8x32xf32>
    %221 = arith.addf %219, %220 : vector<8x32xf32>
    %c0_126 = arith.constant 0 : index
    %c7 = arith.constant 7 : index
    %c0_127 = arith.constant 0 : index
    %c0_128 = arith.constant 0 : index
    %222 = vector.load %arg0[%c0_126, %c7, %c0_127, %c0_128] : memref<3x8x8x32xf32, #tpu.memory_space<vmem>>, vector<1x1x8x32xf32>
    %223 = vector.shape_cast %222 : vector<1x1x8x32xf32> to vector<8x32xf32>
    %c1_129 = arith.constant 1 : index
    %c7_130 = arith.constant 7 : index
    %c0_131 = arith.constant 0 : index
    %c0_132 = arith.constant 0 : index
    %224 = vector.load %arg0[%c1_129, %c7_130, %c0_131, %c0_132] : memref<3x8x8x32xf32, #tpu.memory_space<vmem>>, vector<1x1x8x32xf32>
    %225 = vector.shape_cast %224 : vector<1x1x8x32xf32> to vector<8x32xf32>
    %c2_133 = arith.constant 2 : index
    %c7_134 = arith.constant 7 : index
    %c0_135 = arith.constant 0 : index
    %c0_136 = arith.constant 0 : index
    %226 = vector.load %arg0[%c2_133, %c7_134, %c0_135, %c0_136] : memref<3x8x8x32xf32, #tpu.memory_space<vmem>>, vector<1x1x8x32xf32>
    %227 = vector.shape_cast %226 : vector<1x1x8x32xf32> to vector<8x32xf32>
    %228 = arith.truncf %221 : vector<8x32xf32> to vector<8x32xbf16>
    %cst_137 = arith.constant dense<0.000000e+00> : vector<8x32xf32>
    %229 = tpu.matmul %228, %1, %cst_137 {dimension_numbers = #tpu.dot_dimension_numbers<[1], [0], [0], [1], [0, 0, 1, 1], [], []>} : vector<8x32xbf16>, vector<32x32xbf16>, vector<8x32xf32> -> vector<8x32xf32>
    %cst_138 = arith.constant dense<0.000000e+00> : vector<8x32xf32>
    %230 = tpu.matmul %228, %3, %cst_138 {dimension_numbers = #tpu.dot_dimension_numbers<[1], [0], [0], [1], [0, 0, 1, 1], [], []>} : vector<8x32xbf16>, vector<32x32xbf16>, vector<8x32xf32> -> vector<8x32xf32>
    %cst_139 = arith.constant dense<0.000000e+00> : vector<8x32xf32>
    %231 = tpu.matmul %228, %5, %cst_139 {dimension_numbers = #tpu.dot_dimension_numbers<[1], [0], [0], [1], [0, 0, 1, 1], [], []>} : vector<8x32xbf16>, vector<32x32xbf16>, vector<8x32xf32> -> vector<8x32xf32>
    %232 = vector.broadcast %6 : vector<1x32xf32> to vector<8x32xf32>
    %233 = arith.addf %231, %232 : vector<8x32xf32>
    %234 = arith.addf %223, %229 : vector<8x32xf32>
    %235 = arith.negf %234 : vector<8x32xf32>
    %236 = math.exp %235 : vector<8x32xf32>
    %cst_140 = arith.constant 1.000000e+00 : f32
    %237 = vector.broadcast %cst_140 : f32 to vector<8x32xf32>
    %238 = arith.addf %237, %236 : vector<8x32xf32>
    %239 = arith.divf %237, %238 : vector<8x32xf32>
    %240 = arith.addf %225, %230 : vector<8x32xf32>
    %241 = arith.negf %240 : vector<8x32xf32>
    %242 = math.exp %241 : vector<8x32xf32>
    %cst_141 = arith.constant 1.000000e+00 : f32
    %243 = vector.broadcast %cst_141 : f32 to vector<8x32xf32>
    %244 = arith.addf %243, %242 : vector<8x32xf32>
    %245 = arith.divf %243, %244 : vector<8x32xf32>
    %246 = arith.mulf %239, %233 : vector<8x32xf32>
    %247 = arith.addf %227, %246 : vector<8x32xf32>
    %248 = math.tanh %247 : vector<8x32xf32>
    %cst_142 = arith.constant 1.000000e+00 : f32
    %249 = vector.broadcast %cst_142 : f32 to vector<8x32xf32>
    %250 = arith.subf %249, %245 : vector<8x32xf32>
    %251 = arith.mulf %250, %248 : vector<8x32xf32>
    %252 = arith.mulf %245, %221 : vector<8x32xf32>
    %253 = arith.addf %251, %252 : vector<8x32xf32>
    %254 = arith.truncf %253 : vector<8x32xf32> to vector<8x32xbf16>
    %c0_143 = arith.constant 0 : index
    %c0_144 = arith.constant 0 : index
    %255 = vector.load %arg3[%c0_143, %c0_144] : memref<32x128xbf16, #tpu.memory_space<vmem>>, vector<32x128xbf16>
    %cst_145 = arith.constant dense<0.000000e+00> : vector<8x128xf32>
    %256 = tpu.matmul %254, %255, %cst_145 {dimension_numbers = #tpu.dot_dimension_numbers<[1], [0], [0], [1], [0, 0, 1, 1], [], []>} : vector<8x32xbf16>, vector<32x128xbf16>, vector<8x128xf32> -> vector<8x128xf32>
    %c0_146 = arith.constant 0 : index
    %c0_147 = arith.constant 0 : index
    %257 = vector.load %arg4[%c0_146, %c0_147] : memref<1x128xf32, #tpu.memory_space<vmem>>, vector<1x128xf32>
    %258 = vector.broadcast %257 : vector<1x128xf32> to vector<8x128xf32>
    %259 = arith.addf %256, %258 : vector<8x128xf32>
    %c0_148 = arith.constant 0 : index
    %c0_149 = arith.constant 0 : index
    %260 = vector.load %arg5[%c0_148, %c0_149] : memref<8x128xf32, #tpu.memory_space<vmem>>, vector<8x128xf32>
    tpu.vector_store %arg5[%c0_148, %c0_149], %259 {strides = array<i32>} : memref<8x128xf32, #tpu.memory_space<vmem>>, vector<8x128xf32>,
    return
  }
}

</mosaic_0001>

<bundles_post_ra>
// kernel: intent_classifier_forward.1
= control target key start
LH: loop header
LB: loop body
LE: loop exit
PB: predicated region body
PF: predicated region fallthrough
CT: control target
= control target key end

     0   :  { %v1641_v0 = vmov 0.0   ;;  %vm1642_vm0 = vmmov 0   ;;  %vm83_vm1 = vcmask 261120   ;;  %s1952_s1 = inlined_call_operand.vmem [shape: bf16[3,32,32], index: 1, kind: input, shape index: {}]   ;;  %s1953_s0 = inlined_call_operand.vmem [shape: f32[3,8,8,32], index: 0, kind: input, shape index: {}]   ;;  %s1954_s2 = inlined_call_operand.vmem [shape: f32[1,32], index: 2, kind: input, shape index: {}]   ;;  %s1955_s3 = inlined_call_operand.vmem [shape: bf16[32,128], index: 3, kind: input, shape index: {}]   ;;  %s1956_s4 = inlined_call_operand.vmem [shape: f32[1,128], index: 4, kind: input, shape index: {}]   ;;  %s1957_s5 = inlined_call_operand.vmem [shape: f32[8,128], index: 5, kind: output, shape index: {}]  }
   0x1   :  { %1375 = vmatprep.subr.bf16.mxu0 %v1641_v0  ;;  %v1677_v1 = vld [vmem:[%s1952_s1] sm:$0xff]   ;;  %1379 = vmatprep.mubr.msk.bf16.mxu0 %vm1642_vm0, %v1641_v0  ;;  %v1688_v2 = vld [vmem:[%s1952_s1 + $0x8] sm:$0xff]   ;;  %v1700_v6 = vld [vmem:[%s1952_s1 + $0x10] sm:$0xff]  }
   0x2   :  { %1383 = vmatprep.subr.bf16.mxu1 %v1641_v0  ;;  %1387 = vmatprep.mubr.msk.bf16.mxu1 %vm1642_vm0, %v1641_v0  ;;  %v36_v3 = vld [vmem:[%s1953_s0] sm:$0xff]  ;;  %v1706_v7 = vld [vmem:[%s1952_s1 + $0x18] sm:$0xff]   ;;  %v1733_v24 = vld [vmem:[%s1952_s1 + $0x28] sm:$0xff]  }
   0x3   :  { %1376 = vmatpush3.bf16.msra.mxu0 %v1677_v1  ;;  %v1238_v4 = vmul.f32 -1.442695, %v36_v3  ;;  %v1239_v5 = vld [vmem:[%s1953_s0 + $0x40] sm:$0xff]  ;;  %1384 = vmatpush3.bf16.msra.mxu1 %v1700_v6  ;;  %v1243_v25 = vld [vmem:[%s1953_s0 + $0x8] sm:$0xff]  ;;  %v1257_v59 = vld [vmem:[%s1953_s0 + $0x10] sm:$0xff] }
   0x4   :  { %1377 = vmatprep.subr.bf16.mxu0 %v1641_v0  ;;  %v1240_v8 = vmul.f32 -1.442695, %v1239_v5  ;;  %1385 = vmatprep.subr.bf16.mxu1 %v1641_v0  ;;  %v1716_v13 = vld [vmem:[%s1954_s2] ss:$0 sm:$0xff]  ;;  %v1244_v26 = vld [vmem:[%s1953_s0 + $0x48] sm:$0xff]  ;;  %v1258_v63 = vld [vmem:[%s1953_s0 + $0x50] sm:$0xff] }
   0x5   :  { %1561 = vpow2.f32 %v1238_v4  ;;  %v1241_v15 = vld [vmem:[%s1953_s0 + $0x80] sm:$0xff]  ;;  %v1245_v49 = vld [vmem:[%s1953_s0 + $0x88] sm:$0xff] }
   0x6   :  { %1563 = vpow2.f32 %v1240_v8  ;;  %v1725_v22 = vld [vmem:[%s1952_s1 + $0x20] sm:$0xff]  }
   0x7   :  { %1378 = vmatpush3.bf16.msra.mxu0 %v1688_v2  ;;  %1386 = vmatpush3.bf16.msra.mxu1 %v1706_v7 }
   0x8   :  { %1391 = vmatprep.subr.bf16.mxu0 %v1641_v0  ;;  %1399 = vmatprep.subr.bf16.mxu1 %v1641_v0 }
   0xf   :  { %v1562_v9 = vpop.eup %1561 }
  0x10   :  { %v40_v10 = vadd.f32 1.0, %v1562_v9  ;;  %v1564_v11 = vpop.eup %1563 }
  0x11   :  { %v48_v12 = vadd.f32 1.0, %v1564_v11 }
  0x12   :  { %1565 = vrcp.f32 %v40_v10 }
  0x13   :  { %1567 = vrcp.f32 %v48_v12 }
  0x1c   :  { %v1566_v14 = vpop.eup %1565 }
  0x1d   :  { %v59_v16 = vmul.f32 %v1566_v14, %v1716_v13  ;;  %v1568_v18 = vpop.eup %1567 }
  0x1e   :  { %v62_v19 = vsub.f32 1.0, %v1568_v18 }
  0x1f   :  { %v60_v17 = vadd.f32 %v1241_v15, %v59_v16 }
  0x21   :  { %1569 = vtanh.f32 %v60_v17 }
  0x2b   :  { %v1570_v20 = vpop.eup %1569 }
  0x2c   :  { %v63_v21 = vmul.f32 %v1570_v20, %v62_v19 }
  0x2e   :  { %v70_v23 = vpack.c.bf16 %v63_v21, %v63_v21 }
  0x30   :  { %1380 = vmatmul.mubr.msk.bf16.vlgmr.msra.gmra.mrb[0].mxu0 %vm83_vm1, %v70_v23  ;;  %1388 = vmatmul.mubr.msk.bf16.vlgmr.msra.gmra.mrb[0].mxu1 %vm83_vm1, %v70_v23 }
  0x31   :  { %1392 = vmatpush3.bf16.msra.mxu0 %v1725_v22  ;;  %1395 = vmatprep.mubr.msk.bf16.mxu0 %vm1642_vm0, %v1641_v0 }
  0x32   :  { %1393 = vmatprep.subr.bf16.mxu0 %v1641_v0  ;;  %1400 = vmatpush3.bf16.msra.mxu1 %v1677_v1 }
  0x33   :  { %1401 = vmatprep.subr.bf16.mxu1 %v1641_v0  ;;  %1403 = vmatprep.mubr.msk.bf16.mxu1 %vm1642_vm0, %v1641_v0 }
  0x35   :  { %1394 = vmatpush3.bf16.msra.mxu0 %v1733_v24 }
  0x36   :  { %1407 = vmatprep.subr.bf16.mxu0 %v1641_v0  ;;  %1402 = vmatpush3.bf16.msra.mxu1 %v1688_v2 }
  0x37   :  { %1415 = vmatprep.subr.bf16.mxu1 %v1641_v0 }
  0x38   :  { %1396 = vmatmul.mubr.msk.bf16.vlgmr.msra.gmra.mrb[4].mxu0 %vm83_vm1, %v70_v23 }
  0x39   :  { %1408 = vmatpush3.bf16.msra.mxu0 %v1700_v6  ;;  %1411 = vmatprep.mubr.msk.bf16.mxu0 %vm1642_vm0, %v1641_v0 }
  0x3a   :  { %1409 = vmatprep.subr.bf16.mxu0 %v1641_v0 }
  0x3d   :  { %1410 = vmatpush3.bf16.msra.mxu0 %v1706_v7 }
  0x3e   :  { %1423 = vmatprep.subr.bf16.mxu0 %v1641_v0 }
 0x103   :  { %v121_v27 = vpop.f32.mrb[0].mxu0  ;;  %v173_v28 = vpop.f32.mrb[0].mxu1 }
 0x104   :  { %v231_v29 = vadd.f32 %v1243_v25, %v121_v27  ;;  %v1381_v30 = vpop.f32.mrb[1].mxu0  ;;  %v1389_v31 = vpop.f32.mrb[1].mxu1  ;;  %v238_v33 = vadd.f32 %v1244_v26, %v173_v28  ;;  %v1259_v27 = vld [vmem:[%s1953_s0 + $0x90] sm:$0xff] }
 0x105   :  { %v124_v32 = vpop.f32.mrb[2].mxu0  ;;  %v176_v34 = vpop.f32.mrb[2].mxu1 }
 0x106   :  { %v1255_v35 = vmul.f32 -1.442695, %v231_v29  ;;  %v1382_v36 = vpop.f32.mrb[3].mxu0  ;;  %v1390_v37 = vpop.f32.mrb[3].mxu1  ;;  %v1256_v38 = vmul.f32 -1.442695, %v238_v33 }
 0x107   :  { %v1265_v37 = vld [vmem:[%s1953_s0 + $0x18] sm:$0xff] }
 0x108   :  { %1571 = vpow2.f32 %v1255_v35 }
 0x109   :  { %1573 = vpow2.f32 %v1256_v38 }
 0x10b   :  { %v225_v39 = vpop.f32.mrb[4].mxu0 }
 0x10c   :  { %v1397_v40 = vpop.f32.mrb[5].mxu0  ;;  %v226_v47 = vadd.f32 %v1716_v13, %v225_v39 }
 0x10d   :  { %v228_v41 = vpop.f32.mrb[6].mxu0 }
 0x10e   :  { %v1398_v42 = vpop.f32.mrb[7].mxu0  ;;  %v1266_v41 = vld [vmem:[%s1953_s0 + $0x58] sm:$0xff] }
 0x112   :  { %v1572_v43 = vpop.eup %1571 }
 0x113   :  { %v235_v44 = vadd.f32 1.0, %v1572_v43  ;;  %v1574_v45 = vpop.eup %1573 }
 0x114   :  { %v242_v46 = vadd.f32 1.0, %v1574_v45 }
 0x115   :  { %1575 = vrcp.f32 %v235_v44 }
 0x116   :  { %1577 = vrcp.f32 %v242_v46 }
 0x11f   :  { %v1576_v48 = vpop.eup %1575 }
 0x120   :  { %v245_v50 = vmul.f32 %v1576_v48, %v226_v47  ;;  %v1578_v52 = vpop.eup %1577 }
 0x121   :  { %v248_v53 = vsub.f32 1.0, %v1578_v52  ;;  %v250_v55 = vmul.f32 %v1578_v52, %v63_v21 }
 0x122   :  { %v246_v51 = vadd.f32 %v1245_v49, %v245_v50 }
 0x124   :  { %1579 = vtanh.f32 %v246_v51 }
 0x12e   :  { %v1580_v54 = vpop.eup %1579 }
 0x12f   :  { %v249_v56 = vmul.f32 %v1580_v54, %v248_v53 }
 0x131   :  { %v251_v57 = vadd.f32 %v250_v55, %v249_v56 }
 0x133   :  { %v258_v58 = vpack.c.bf16 %v251_v57, %v251_v57 }
 0x135   :  { %1404 = vmatmul.mubr.msk.bf16.vlgmr.msra.gmra.mrb[4].mxu1 %vm83_vm1, %v258_v58  ;;  %1412 = vmatmul.mubr.msk.bf16.vlgmr.msra.gmra.mrb[8].mxu0 %vm83_vm1, %v258_v58 }
 0x136   :  { %1416 = vmatpush3.bf16.msra.mxu1 %v1725_v22  ;;  %1419 = vmatprep.mubr.msk.bf16.mxu1 %vm1642_vm0, %v1641_v0 }
 0x137   :  { %1417 = vmatprep.subr.bf16.mxu1 %v1641_v0  ;;  %1424 = vmatpush3.bf16.msra.mxu0 %v1677_v1 }
 0x138   :  { %1425 = vmatprep.subr.bf16.mxu0 %v1641_v0  ;;  %1427 = vmatprep.mubr.msk.bf16.mxu0 %vm1642_vm0, %v1641_v0 }
 0x13a   :  { %1418 = vmatpush3.bf16.msra.mxu1 %v1733_v24 }
 0x13b   :  { %1431 = vmatprep.subr.bf16.mxu1 %v1641_v0  ;;  %1426 = vmatpush3.bf16.msra.mxu0 %v1688_v2 }
 0x13c   :  { %1439 = vmatprep.subr.bf16.mxu0 %v1641_v0 }
 0x13d   :  { %1420 = vmatmul.mubr.msk.bf16.vlgmr.msra.gmra.mrb[8].mxu1 %vm83_vm1, %v258_v58 }
 0x13e   :  { %1432 = vmatpush3.bf16.msra.mxu1 %v1700_v6  ;;  %1435 = vmatprep.mubr.msk.bf16.mxu1 %vm1642_vm0, %v1641_v0 }
 0x13f   :  { %1433 = vmatprep.subr.bf16.mxu1 %v1641_v0 }
 0x142   :  { %1434 = vmatpush3.bf16.msra.mxu1 %v1706_v7 }
 0x143   :  { %1447 = vmatprep.subr.bf16.mxu1 %v1641_v0 }
 0x208   :  { %v296_v60 = vpop.f32.mrb[4].mxu1  ;;  %v336_v61 = vpop.f32.mrb[8].mxu0 }
 0x209   :  { %v382_v62 = vadd.f32 %v1257_v59, %v296_v60  ;;  %v1405_v3 = vpop.f32.mrb[5].mxu1  ;;  %v1413_v4 = vpop.f32.mrb[9].mxu0  ;;  %v389_v12 = vadd.f32 %v1258_v63, %v336_v61  ;;  %v1267_v61 = vld [vmem:[%s1953_s0 + $0x98] sm:$0xff] }
 0x20a   :  { %v299_v5 = vpop.f32.mrb[6].mxu1  ;;  %v339_v8 = vpop.f32.mrb[10].mxu0 }
 0x20b   :  { %v1263_v9 = vmul.f32 -1.442695, %v382_v62  ;;  %v1406_v10 = vpop.f32.mrb[7].mxu1  ;;  %v1414_v11 = vpop.f32.mrb[11].mxu0  ;;  %v1264_v14 = vmul.f32 -1.442695, %v389_v12 }
 0x20c   :  { %v1273_v12 = vld [vmem:[%s1953_s0 + $0x20] sm:$0xff] }
 0x20d   :  { %1581 = vpow2.f32 %v1263_v9 }
 0x20e   :  { %1583 = vpow2.f32 %v1264_v14 }
 0x210   :  { %v376_v15 = vpop.f32.mrb[8].mxu1 }
 0x211   :  { %v1421_v16 = vpop.f32.mrb[9].mxu1  ;;  %v377_v25 = vadd.f32 %v1716_v13, %v376_v15 }
 0x212   :  { %v379_v17 = vpop.f32.mrb[10].mxu1 }
 0x213   :  { %v1422_v18 = vpop.f32.mrb[11].mxu1  ;;  %v1274_v17 = vld [vmem:[%s1953_s0 + $0x60] sm:$0xff] }
 0x217   :  { %v1582_v19 = vpop.eup %1581 }
 0x218   :  { %v386_v20 = vadd.f32 1.0, %v1582_v19  ;;  %v1584_v21 = vpop.eup %1583 }
 0x219   :  { %v393_v23 = vadd.f32 1.0, %v1584_v21 }
 0x21a   :  { %1585 = vrcp.f32 %v386_v20 }
 0x21b   :  { %1587 = vrcp.f32 %v393_v23 }
 0x224   :  { %v1586_v26 = vpop.eup %1585 }
 0x225   :  { %v396_v28 = vmul.f32 %v1586_v26, %v377_v25  ;;  %v1588_v30 = vpop.eup %1587 }
 0x226   :  { %v399_v31 = vsub.f32 1.0, %v1588_v30  ;;  %v401_v33 = vmul.f32 %v1588_v30, %v251_v57 }
 0x227   :  { %v397_v29 = vadd.f32 %v1259_v27, %v396_v28 }
 0x229   :  { %1589 = vtanh.f32 %v397_v29 }
 0x233   :  { %v1590_v32 = vpop.eup %1589 }
 0x234   :  { %v400_v34 = vmul.f32 %v1590_v32, %v399_v31 }
 0x236   :  { %v402_v35 = vadd.f32 %v401_v33, %v400_v34 }
 0x238   :  { %v409_v36 = vpack.c.bf16 %v402_v35, %v402_v35 }
 0x23a   :  { %1428 = vmatmul.mubr.msk.bf16.vlgmr.msra.gmra.mrb[12].mxu0 %vm83_vm1, %v409_v36  ;;  %1436 = vmatmul.mubr.msk.bf16.vlgmr.msra.gmra.mrb[12].mxu1 %vm83_vm1, %v409_v36 }
 0x23b   :  { %1440 = vmatpush3.bf16.msra.mxu0 %v1725_v22  ;;  %1443 = vmatprep.mubr.msk.bf16.mxu0 %vm1642_vm0, %v1641_v0 }
 0x23c   :  { %1441 = vmatprep.subr.bf16.mxu0 %v1641_v0  ;;  %1448 = vmatpush3.bf16.msra.mxu1 %v1677_v1 }
 0x23d   :  { %1449 = vmatprep.subr.bf16.mxu1 %v1641_v0  ;;  %1451 = vmatprep.mubr.msk.bf16.mxu1 %vm1642_vm0, %v1641_v0 }
 0x23f   :  { %1442 = vmatpush3.bf16.msra.mxu0 %v1733_v24 }
 0x240   :  { %1455 = vmatprep.subr.bf16.mxu0 %v1641_v0  ;;  %1450 = vmatpush3.bf16.msra.mxu1 %v1688_v2 }
 0x241   :  { %1463 = vmatprep.subr.bf16.mxu1 %v1641_v0 }
 0x242   :  { %1444 = vmatmul.mubr.msk.bf16.vlgmr.msra.gmra.mrb[16].mxu0 %vm83_vm1, %v409_v36 }
 0x243   :  { %1456 = vmatpush3.bf16.msra.mxu0 %v1700_v6  ;;  %1459 = vmatprep.mubr.msk.bf16.mxu0 %vm1642_vm0, %v1641_v0 }
 0x244   :  { %1457 = vmatprep.subr.bf16.mxu0 %v1641_v0 }
 0x247   :  { %1458 = vmatpush3.bf16.msra.mxu0 %v1706_v7 }
 0x248   :  { %1471 = vmatprep.subr.bf16.mxu0 %v1641_v0 }
 0x30d   :  { %v447_v38 = vpop.f32.mrb[12].mxu0  ;;  %v487_v39 = vpop.f32.mrb[12].mxu1 }
 0x30e   :  { %v533_v40 = vadd.f32 %v1265_v37, %v447_v38  ;;  %v1429_v42 = vpop.f32.mrb[13].mxu0  ;;  %v1437_v43 = vpop.f32.mrb[13].mxu1  ;;  %v540_v49 = vadd.f32 %v1266_v41, %v487_v39  ;;  %v1275_v39 = vld [vmem:[%s1953_s0 + $0xa0] sm:$0xff] }
 0x30f   :  { %v450_v44 = vpop.f32.mrb[14].mxu0  ;;  %v490_v45 = vpop.f32.mrb[14].mxu1 }
 0x310   :  { %v1271_v46 = vmul.f32 -1.442695, %v533_v40  ;;  %v1430_v47 = vpop.f32.mrb[15].mxu0  ;;  %v1438_v48 = vpop.f32.mrb[15].mxu1  ;;  %v1272_v50 = vmul.f32 -1.442695, %v540_v49 }
 0x311   :  { %v1281_v49 = vld [vmem:[%s1953_s0 + $0x28] sm:$0xff] }
 0x312   :  { %1591 = vpow2.f32 %v1271_v46 }
 0x313   :  { %1593 = vpow2.f32 %v1272_v50 }
 0x315   :  { %v527_v51 = vpop.f32.mrb[16].mxu0 }
 0x316   :  { %v1445_v52 = vpop.f32.mrb[17].mxu0  ;;  %v528_v59 = vadd.f32 %v1716_v13, %v527_v51 }
 0x317   :  { %v530_v53 = vpop.f32.mrb[18].mxu0 }
 0x318   :  { %v1446_v54 = vpop.f32.mrb[19].mxu0  ;;  %v1282_v53 = vld [vmem:[%s1953_s0 + $0x68] sm:$0xff] }
 0x31c   :  { %v1592_v55 = vpop.eup %1591 }
 0x31d   :  { %v537_v56 = vadd.f32 1.0, %v1592_v55  ;;  %v1594_v57 = vpop.eup %1593 }
 0x31e   :  { %v544_v58 = vadd.f32 1.0, %v1594_v57 }
 0x31f   :  { %1595 = vrcp.f32 %v537_v56 }
 0x320   :  { %1597 = vrcp.f32 %v544_v58 }
 0x329   :  { %v1596_v60 = vpop.eup %1595 }
 0x32a   :  { %v547_v62 = vmul.f32 %v1596_v60, %v528_v59  ;;  %v1598_v3 = vpop.eup %1597 }
 0x32b   :  { %v550_v4 = vsub.f32 1.0, %v1598_v3  ;;  %v552_v8 = vmul.f32 %v1598_v3, %v402_v35 }
 0x32c   :  { %v548_v63 = vadd.f32 %v1267_v61, %v547_v62 }
 0x32e   :  { %1599 = vtanh.f32 %v548_v63 }
 0x338   :  { %v1600_v5 = vpop.eup %1599 }
 0x339   :  { %v551_v9 = vmul.f32 %v1600_v5, %v550_v4 }
 0x33b   :  { %v553_v10 = vadd.f32 %v552_v8, %v551_v9 }
 0x33d   :  { %v560_v11 = vpack.c.bf16 %v553_v10, %v553_v10 }
 0x33f   :  { %1452 = vmatmul.mubr.msk.bf16.vlgmr.msra.gmra.mrb[16].mxu1 %vm83_vm1, %v560_v11  ;;  %1460 = vmatmul.mubr.msk.bf16.vlgmr.msra.gmra.mrb[20].mxu0 %vm83_vm1, %v560_v11 }
 0x340   :  { %1464 = vmatpush3.bf16.msra.mxu1 %v1725_v22  ;;  %1467 = vmatprep.mubr.msk.bf16.mxu1 %vm1642_vm0, %v1641_v0 }
 0x341   :  { %1465 = vmatprep.subr.bf16.mxu1 %v1641_v0  ;;  %1472 = vmatpush3.bf16.msra.mxu0 %v1677_v1 }
 0x342   :  { %1473 = vmatprep.subr.bf16.mxu0 %v1641_v0  ;;  %1475 = vmatprep.mubr.msk.bf16.mxu0 %vm1642_vm0, %v1641_v0 }
 0x344   :  { %1466 = vmatpush3.bf16.msra.mxu1 %v1733_v24 }
 0x345   :  { %1479 = vmatprep.subr.bf16.mxu1 %v1641_v0  ;;  %1474 = vmatpush3.bf16.msra.mxu0 %v1688_v2 }
 0x346   :  { %1487 = vmatprep.subr.bf16.mxu0 %v1641_v0 }
 0x347   :  { %1468 = vmatmul.mubr.msk.bf16.vlgmr.msra.gmra.mrb[20].mxu1 %vm83_vm1, %v560_v11 }
 0x348   :  { %1480 = vmatpush3.bf16.msra.mxu1 %v1700_v6  ;;  %1483 = vmatprep.mubr.msk.bf16.mxu1 %vm1642_vm0, %v1641_v0 }
 0x349   :  { %1481 = vmatprep.subr.bf16.mxu1 %v1641_v0 }
 0x34c   :  { %1482 = vmatpush3.bf16.msra.mxu1 %v1706_v7 }
 0x34d   :  { %1495 = vmatprep.subr.bf16.mxu1 %v1641_v0 }
 0x412   :  { %v598_v14 = vpop.f32.mrb[16].mxu1  ;;  %v638_v15 = vpop.f32.mrb[20].mxu0 }
 0x413   :  { %v684_v16 = vadd.f32 %v1273_v12, %v598_v14  ;;  %v1453_v18 = vpop.f32.mrb[17].mxu1  ;;  %v1461_v19 = vpop.f32.mrb[21].mxu0  ;;  %v691_v27 = vadd.f32 %v1274_v17, %v638_v15  ;;  %v1283_v15 = vld [vmem:[%s1953_s0 + $0xa8] sm:$0xff] }
 0x414   :  { %v601_v20 = vpop.f32.mrb[18].mxu1  ;;  %v641_v21 = vpop.f32.mrb[22].mxu0 }
 0x415   :  { %v1279_v23 = vmul.f32 -1.442695, %v684_v16  ;;  %v1454_v25 = vpop.f32.mrb[19].mxu1  ;;  %v1462_v26 = vpop.f32.mrb[23].mxu0  ;;  %v1280_v28 = vmul.f32 -1.442695, %v691_v27 }
 0x417   :  { %1601 = vpow2.f32 %v1279_v23 }
 0x418   :  { %1603 = vpow2.f32 %v1280_v28 }
 0x41a   :  { %v678_v29 = vpop.f32.mrb[20].mxu1 }
 0x41b   :  { %v1469_v30 = vpop.f32.mrb[21].mxu1  ;;  %v679_v37 = vadd.f32 %v1716_v13, %v678_v29 }
 0x41c   :  { %v681_v31 = vpop.f32.mrb[22].mxu1 }
 0x41d   :  { %v1470_v32 = vpop.f32.mrb[23].mxu1 }
 0x421   :  { %v1602_v33 = vpop.eup %1601 }
 0x422   :  { %v688_v34 = vadd.f32 1.0, %v1602_v33  ;;  %v1604_v35 = vpop.eup %1603 }
 0x423   :  { %v695_v36 = vadd.f32 1.0, %v1604_v35 }
 0x424   :  { %1605 = vrcp.f32 %v688_v34 }
 0x425   :  { %1607 = vrcp.f32 %v695_v36 }
 0x42e   :  { %v1606_v38 = vpop.eup %1605 }
 0x42f   :  { %v698_v40 = vmul.f32 %v1606_v38, %v679_v37  ;;  %v1608_v42 = vpop.eup %1607 }
 0x430   :  { %v701_v43 = vsub.f32 1.0, %v1608_v42  ;;  %v703_v45 = vmul.f32 %v1608_v42, %v553_v10 }
 0x431   :  { %v699_v41 = vadd.f32 %v1275_v39, %v698_v40 }
 0x433   :  { %1609 = vtanh.f32 %v699_v41 }
 0x43d   :  { %v1610_v44 = vpop.eup %1609 }
 0x43e   :  { %v702_v46 = vmul.f32 %v1610_v44, %v701_v43 }
 0x440   :  { %v704_v47 = vadd.f32 %v703_v45, %v702_v46 }
 0x442   :  { %v711_v48 = vpack.c.bf16 %v704_v47, %v704_v47 }
 0x444   :  { %1476 = vmatmul.mubr.msk.bf16.vlgmr.msra.gmra.mrb[24].mxu0 %vm83_vm1, %v711_v48  ;;  %1484 = vmatmul.mubr.msk.bf16.vlgmr.msra.gmra.mrb[24].mxu1 %vm83_vm1, %v711_v48 }
 0x445   :  { %1488 = vmatpush3.bf16.msra.mxu0 %v1725_v22  ;;  %1491 = vmatprep.mubr.msk.bf16.mxu0 %vm1642_vm0, %v1641_v0 }
 0x446   :  { %1489 = vmatprep.subr.bf16.mxu0 %v1641_v0  ;;  %1496 = vmatpush3.bf16.msra.mxu1 %v1677_v1 }
 0x447   :  { %1497 = vmatprep.subr.bf16.mxu1 %v1641_v0  ;;  %1499 = vmatprep.mubr.msk.bf16.mxu1 %vm1642_vm0, %v1641_v0 }
 0x449   :  { %1490 = vmatpush3.bf16.msra.mxu0 %v1733_v24 }
 0x44a   :  { %1503 = vmatprep.subr.bf16.mxu0 %v1641_v0  ;;  %1498 = vmatpush3.bf16.msra.mxu1 %v1688_v2 }
 0x44b   :  { %1511 = vmatprep.subr.bf16.mxu1 %v1641_v0 }
 0x44c   :  { %1492 = vmatmul.mubr.msk.bf16.vlgmr.msra.gmra.mrb[28].mxu0 %vm83_vm1, %v711_v48 }
 0x44d   :  { %1504 = vmatpush3.bf16.msra.mxu0 %v1700_v6  ;;  %1507 = vmatprep.mubr.msk.bf16.mxu0 %vm1642_vm0, %v1641_v0 }
 0x44e   :  { %1505 = vmatprep.subr.bf16.mxu0 %v1641_v0 }
 0x451   :  { %1506 = vmatpush3.bf16.msra.mxu0 %v1706_v7 }
 0x452   :  { %1519 = vmatprep.subr.bf16.mxu0 %v1641_v0 }
 0x517   :  { %v749_v50 = vpop.f32.mrb[24].mxu0  ;;  %v789_v51 = vpop.f32.mrb[24].mxu1 }
 0x518   :  { %v835_v52 = vadd.f32 %v1281_v49, %v749_v50  ;;  %v1477_v54 = vpop.f32.mrb[25].mxu0  ;;  %v1485_v55 = vpop.f32.mrb[25].mxu1  ;;  %v842_v61 = vadd.f32 %v1282_v53, %v789_v51 }
 0x519   :  { %v752_v56 = vpop.f32.mrb[26].mxu0  ;;  %v792_v57 = vpop.f32.mrb[26].mxu1 }
 0x51a   :  { %v1287_v58 = vmul.f32 -1.442695, %v835_v52  ;;  %v1478_v59 = vpop.f32.mrb[27].mxu0  ;;  %v1486_v60 = vpop.f32.mrb[27].mxu1  ;;  %v1288_v62 = vmul.f32 -1.442695, %v842_v61 }
 0x51b   :  { %v1559_v57 = vld [vmem:[%s1955_s3] sm:$0xff]   ;;  %v1298_v61 = vld [vmem:[%s1953_s0 + $0x78] sm:$0xff] }
 0x51c   :  { %1611 = vpow2.f32 %v1287_v58  ;;  %v1297_v58 = vld [vmem:[%s1953_s0 + $0x38] sm:$0xff] }
 0x51d   :  { %1613 = vpow2.f32 %v1288_v62 }
 0x51f   :  { %v829_v63 = vpop.f32.mrb[28].mxu0 }
 0x520   :  { %v1493_v3 = vpop.f32.mrb[29].mxu0  ;;  %v830_v12 = vadd.f32 %v1716_v13, %v829_v63 }
 0x521   :  { %v832_v4 = vpop.f32.mrb[30].mxu0 }
 0x522   :  { %v1494_v5 = vpop.f32.mrb[31].mxu0 }
 0x526   :  { %v1612_v8 = vpop.eup %1611 }
 0x527   :  { %v839_v9 = vadd.f32 1.0, %v1612_v8  ;;  %v1614_v10 = vpop.eup %1613 }
 0x528   :  { %v846_v11 = vadd.f32 1.0, %v1614_v10 }
 0x529   :  { %1615 = vrcp.f32 %v839_v9 }
 0x52a   :  { %1617 = vrcp.f32 %v846_v11 }
 0x533   :  { %v1616_v14 = vpop.eup %1615 }
 0x534   :  { %v849_v16 = vmul.f32 %v1616_v14, %v830_v12  ;;  %v1618_v18 = vpop.eup %1617 }
 0x535   :  { %v852_v19 = vsub.f32 1.0, %v1618_v18  ;;  %v854_v21 = vmul.f32 %v1618_v18, %v704_v47  ;;  %v1291_v47 = vld [vmem:[%s1953_s0 + $0xb0] sm:$0xff] }
 0x536   :  { %v850_v17 = vadd.f32 %v1283_v15, %v849_v16 }
 0x538   :  { %1619 = vtanh.f32 %v850_v17 }
 0x542   :  { %v1620_v20 = vpop.eup %1619 }
 0x543   :  { %v853_v23 = vmul.f32 %v1620_v20, %v852_v19 }
 0x545   :  { %v855_v25 = vadd.f32 %v854_v21, %v853_v23  ;;  %v1299_v23 = vld [vmem:[%s1953_s0 + $0xb8] sm:$0xff] }
 0x547   :  { %v862_v26 = vpack.c.bf16 %v855_v25, %v855_v25 }
 0x549   :  { %1500 = vmatmul.mubr.msk.bf16.vlgmr.msra.gmra.mrb[28].mxu1 %vm83_vm1, %v862_v26  ;;  %1508 = vmatmul.mubr.msk.bf16.vlgmr.msra.gmra.mrb[32].mxu0 %vm83_vm1, %v862_v26 }
 0x54a   :  { %1512 = vmatpush3.bf16.msra.mxu1 %v1725_v22  ;;  %1515 = vmatprep.mubr.msk.bf16.mxu1 %vm1642_vm0, %v1641_v0 }
 0x54b   :  { %1513 = vmatprep.subr.bf16.mxu1 %v1641_v0  ;;  %1520 = vmatpush3.bf16.msra.mxu0 %v1677_v1  ;;  %v1289_v1 = vld [vmem:[%s1953_s0 + $0x30] sm:$0xff] }
 0x54c   :  { %1521 = vmatprep.subr.bf16.mxu0 %v1641_v0  ;;  %1523 = vmatprep.mubr.msk.bf16.mxu0 %vm1642_vm0, %v1641_v0 }
 0x54e   :  { %1514 = vmatpush3.bf16.msra.mxu1 %v1733_v24 }
 0x54f   :  { %1527 = vmatprep.subr.bf16.mxu1 %v1641_v0  ;;  %1522 = vmatpush3.bf16.msra.mxu0 %v1688_v2 }
 0x550   :  { %1535 = vmatprep.subr.bf16.mxu0 %v1641_v0 }
 0x551   :  { %1516 = vmatmul.mubr.msk.bf16.vlgmr.msra.gmra.mrb[32].mxu1 %vm83_vm1, %v862_v26 }
 0x552   :  { %1528 = vmatpush3.bf16.msra.mxu1 %v1700_v6  ;;  %1531 = vmatprep.mubr.msk.bf16.mxu1 %vm1642_vm0, %v1641_v0  ;;  %v1290_v6 = vld [vmem:[%s1953_s0 + $0x70] sm:$0xff] }
 0x553   :  { %1529 = vmatprep.subr.bf16.mxu1 %v1641_v0 }
 0x556   :  { %1530 = vmatpush3.bf16.msra.mxu1 %v1706_v7 }
 0x557   :  { %1543 = vmatprep.subr.bf16.mxu1 %v1641_v0 }
 0x61c   :  { %v900_v2 = vpop.f32.mrb[28].mxu1  ;;  %v940_v27 = vpop.f32.mrb[32].mxu0 }
 0x61d   :  { %v986_v28 = vadd.f32 %v1289_v1, %v900_v2  ;;  %v1501_v29 = vpop.f32.mrb[29].mxu1  ;;  %v1509_v30 = vpop.f32.mrb[33].mxu0  ;;  %v993_v35 = vadd.f32 %v1290_v6, %v940_v27 }
 0x61e   :  { %v903_v31 = vpop.f32.mrb[30].mxu1  ;;  %v943_v32 = vpop.f32.mrb[34].mxu0 }
 0x61f   :  { %v1295_v33 = vmul.f32 -1.442695, %v986_v28  ;;  %v1502_v34 = vpop.f32.mrb[31].mxu1  ;;  %v1510_v7 = vpop.f32.mrb[35].mxu0  ;;  %v1296_v36 = vmul.f32 -1.442695, %v993_v35 }
 0x621   :  { %1621 = vpow2.f32 %v1295_v33 }
 0x622   :  { %1623 = vpow2.f32 %v1296_v36 }
 0x624   :  { %v980_v37 = vpop.f32.mrb[32].mxu1 }
 0x625   :  { %v1517_v38 = vpop.f32.mrb[33].mxu1  ;;  %v981_v45 = vadd.f32 %v1716_v13, %v980_v37 }
 0x626   :  { %v983_v39 = vpop.f32.mrb[34].mxu1 }
 0x627   :  { %v1518_v40 = vpop.f32.mrb[35].mxu1 }
 0x62b   :  { %v1622_v41 = vpop.eup %1621 }
 0x62c   :  { %v990_v42 = vadd.f32 1.0, %v1622_v41  ;;  %v1624_v43 = vpop.eup %1623 }
 0x62d   :  { %v997_v44 = vadd.f32 1.0, %v1624_v43 }
 0x62e   :  { %1625 = vrcp.f32 %v990_v42 }
 0x62f   :  { %1627 = vrcp.f32 %v997_v44 }
 0x638   :  { %v1626_v46 = vpop.eup %1625 }
 0x639   :  { %v1000_v48 = vmul.f32 %v1626_v46, %v981_v45  ;;  %v1628_v50 = vpop.eup %1627 }
 0x63a   :  { %v1003_v51 = vsub.f32 1.0, %v1628_v50  ;;  %v1005_v53 = vmul.f32 %v1628_v50, %v855_v25 }
 0x63b   :  { %v1001_v49 = vadd.f32 %v1291_v47, %v1000_v48 }
 0x63d   :  { %1629 = vtanh.f32 %v1001_v49 }
 0x647   :  { %v1630_v52 = vpop.eup %1629 }
 0x648   :  { %v1004_v54 = vmul.f32 %v1630_v52, %v1003_v51 }
 0x64a   :  { %v1006_v55 = vadd.f32 %v1005_v53, %v1004_v54 }
 0x64c   :  { %v1013_v56 = vpack.c.bf16 %v1006_v55, %v1006_v55 }
 0x64e   :  { %1524 = vmatmul.mubr.msk.bf16.vlgmr.msra.gmra.mrb[36].mxu0 %vm83_vm1, %v1013_v56  ;;  %1532 = vmatmul.mubr.msk.bf16.vlgmr.msra.gmra.mrb[36].mxu1 %vm83_vm1, %v1013_v56 }
 0x64f   :  { %1536 = vmatpush3.bf16.msra.mxu0 %v1725_v22  ;;  %1539 = vmatprep.mubr.msk.bf16.mxu0 %vm1642_vm0, %v1641_v0  ;;  %v1560_v22 = vld [vmem:[%s1955_s3 + $0x8] sm:$0xff]  }
 0x650   :  { %1537 = vmatprep.subr.bf16.mxu0 %v1641_v0  ;;  %1547 = vmatprep.mubr.msk.bf16.mxu1 %vm1642_vm0, %v1641_v0 }
 0x651   :  { %1544 = vmatpush3.bf16.msra.mxu1 %v1559_v57 }
 0x652   :  { %1545 = vmatprep.subr.bf16.mxu1 %v1641_v0 }
 0x653   :  { %1538 = vmatpush3.bf16.msra.mxu0 %v1733_v24 }
 0x655   :  { %1546 = vmatpush3.bf16.msra.mxu1 %v1560_v22 }
 0x656   :  { %1540 = vmatmul.mubr.msk.bf16.vlgmr.msra.gmra.mrb[40].mxu0 %vm83_vm1, %v1013_v56 }
 0x721   :  { %v1051_v59 = vpop.f32.mrb[36].mxu0  ;;  %v1091_v24 = vpop.f32.mrb[36].mxu1 }
 0x722   :  { %v1137_v60 = vadd.f32 %v1297_v58, %v1051_v59  ;;  %v1525_v62 = vpop.f32.mrb[37].mxu0  ;;  %v1533_v63 = vpop.f32.mrb[37].mxu1  ;;  %v1144_v0 = vadd.f32 %v1298_v61, %v1091_v24 }
 0x723   :  { %v1054_v3 = vpop.f32.mrb[38].mxu0  ;;  %v1094_v4 = vpop.f32.mrb[38].mxu1 }
 0x724   :  { %v1303_v5 = vmul.f32 -1.442695, %v1137_v60  ;;  %v1526_v8 = vpop.f32.mrb[39].mxu0  ;;  %v1534_v9 = vpop.f32.mrb[39].mxu1  ;;  %v1304_v10 = vmul.f32 -1.442695, %v1144_v0 }
 0x726   :  { %1631 = vpow2.f32 %v1303_v5 }
 0x727   :  { %1633 = vpow2.f32 %v1304_v10 }
 0x729   :  { %v1131_v11 = vpop.f32.mrb[40].mxu0 }
 0x72a   :  { %v1541_v12 = vpop.f32.mrb[41].mxu0  ;;  %v1132_v20 = vadd.f32 %v1716_v13, %v1131_v11  ;;  %v1305_v13 = vld [vmem:[%s1956_s4] ss:$0 sm:$0xff] }
 0x72b   :  { %v1134_v14 = vpop.f32.mrb[42].mxu0 }
 0x72c   :  { %v1542_v15 = vpop.f32.mrb[43].mxu0 }
 0x730   :  { %v1632_v16 = vpop.eup %1631 }
 0x731   :  { %v1141_v17 = vadd.f32 1.0, %v1632_v16  ;;  %v1634_v18 = vpop.eup %1633 }
 0x732   :  { %v1148_v19 = vadd.f32 1.0, %v1634_v18 }
 0x733   :  { %1635 = vrcp.f32 %v1141_v17 }
 0x734   :  { %1637 = vrcp.f32 %v1148_v19 }
 0x73d   :  { %v1636_v21 = vpop.eup %1635 }
 0x73e   :  { %v1151_v25 = vmul.f32 %v1636_v21, %v1132_v20  ;;  %v1638_v1 = vpop.eup %1637 }
 0x73f   :  { %v1154_v2 = vsub.f32 1.0, %v1638_v1  ;;  %v1156_v6 = vmul.f32 %v1638_v1, %v1006_v55 }
 0x740   :  { %v1152_v26 = vadd.f32 %v1299_v23, %v1151_v25 }
 0x742   :  { %1639 = vtanh.f32 %v1152_v26 }
 0x74c   :  { %v1640_v27 = vpop.eup %1639 }
 0x74d   :  { %v1155_v28 = vmul.f32 %v1640_v27, %v1154_v2 }
 0x74f   :  { %v1157_v29 = vadd.f32 %v1156_v6, %v1155_v28 }
 0x751   :  { %v1158_v30 = vpack.c.bf16 %v1157_v29, %v1157_v29 }
 0x753   :  { %1548 = vmatmul.mubr.msk.bf16.vlgmr.msra.gmra.mrb[40].mxu1 %vm83_vm1, %v1158_v30 }
 0x826   :  { %v1219_v31 = vpop.f32.mrb[40].mxu1 }
 0x827   :  { %v1220_v32 = vadd.f32 %v1305_v13, %v1219_v31  ;;  %v1549_v33 = vpop.f32.mrb[41].mxu1 }
 0x828   :  { %v1222_v34 = vpop.f32.mrb[42].mxu1 }
 0x829   :  { %1225 = vst [vmem:[%s1957_s5] sm:$0xff] %v1220_v32  ;;  %v1550_v7 = vpop.f32.mrb[43].mxu1 }

</bundles_post_ra>
